<compile_context>
chip_gen: v7x
topology: tpu7x:2x2x1
jax: 0.10.0
libtpu: 0.0.40
codegen_flags: <defaults>
</compile_context>

<pallas_src>
import jax
import jax.numpy as jnp
from jax.experimental import pallas as pl
from jax.experimental.pallas import tpu as pltpu


def copy_kernel(x_ref, o_ref):
    # Straight sublane/lane-dense copy of a (block_rows, lanes) tile.
    # TODO(synk): this copy is pure overhead -- the op itself is a metadata-only
    # view; without the "must be a Pallas kernel" constraint, use jnp.reshape.
    o_ref[...] = x_ref[...]


def reshape_forward(x, *, lanes=1024, block_rows=512):
    """Equivalent of Reshape.forward: x.view(x.shape[1], 1).

    `lanes` must be a multiple of 128, `block_rows` a multiple of 8.
    Default block = 512 x 1024 f32 = 2 MiB (safe on v5e/v6e/v7x VMEM budgets).
    """
    assert x.ndim >= 2 and x.size == x.shape[1], (
        "x.view(x.shape[1], 1) requires numel(x) == x.shape[1]"
    )
    assert lanes % 128 == 0 and block_rows % 8 == 0
    n = x.shape[1]
    dtype = x.dtype

    # Metadata-only flatten.
    flat = x.reshape(n)

    # Present a sublane/lane-dense (rows, lanes) slab to the kernel.
    if n % lanes == 0:
        slab = flat.reshape(n // lanes, lanes)
        pad = 0
    else:
        n_pad = ((n + lanes - 1) // lanes) * lanes
        pad = n_pad - n
        slab = jnp.pad(flat, (0, pad)).reshape(n_pad // lanes, lanes)

    rows = slab.shape[0]
    # Block rows: either the full row extent (always legal) or a multiple of 8.
    bm = rows if rows < block_rows else block_rows
    grid = (pl.cdiv(rows, bm),)  # last block may be partial; copy is safe

    itemsize = jnp.dtype(dtype).itemsize
    out_slab = pl.pallas_call(
        copy_kernel,
        out_shape=jax.ShapeDtypeStruct(slab.shape, dtype),
        grid=grid,
        in_specs=[pl.BlockSpec((bm, lanes), lambda i: (i, 0))],
        out_specs=pl.BlockSpec((bm, lanes), lambda i: (i, 0)),
        input_output_aliases={0: 0},
        cost_estimate=pl.CostEstimate(
            flops=0,
            transcendentals=0,
            bytes_accessed=2 * slab.size * itemsize,
        ),
        compiler_params=pltpu.CompilerParams(
            dimension_semantics=("parallel",)),
    )(slab)

    out_flat = out_slab.reshape(-1)
    if pad:
        out_flat = out_flat[:n]
    # Metadata-only relayout to the PyTorch output shape (N, 1).
    return out_flat.reshape(n, 1)


if __name__ == "__main__":
    key = jax.random.PRNGKey(0)

    # Case 1: small ragged N (typical LSTM hidden size) -> padded single block.
    n1 = 32
    x1 = jax.random.normal(key, (1, n1), dtype=jnp.float32)
    out1 = jax.block_until_ready(reshape_forward(x1))
    assert out1.shape == (n1, 1) and out1.dtype == x1.dtype
    assert jnp.allclose(out1, x1.reshape(n1, 1))

    # Case 2: N divisible by 1024 -> dense slab, no padding, single block.
    n2 = 2048
    x2 = jax.random.normal(jax.random.PRNGKey(1), (1, n2), dtype=jnp.float32)
    out2 = jax.block_until_ready(reshape_forward(x2))
    assert out2.shape == (n2, 1) and out2.dtype == x2.dtype
    assert jnp.allclose(out2, x2.reshape(n2, 1))

    # Case 3: multi-block grid with a partial last block (rows=20, bm=8 -> 3 steps).
    n3 = 20 * 1024
    x3 = jax.random.normal(jax.random.PRNGKey(2), (1, n3), dtype=jnp.float32)
    out3 = jax.block_until_ready(reshape_forward(x3, block_rows=8))
    assert out3.shape == (n3, 1) and out3.dtype == x3.dtype
    assert jnp.allclose(out3, x3.reshape(n3, 1))

    print("KERNEL_OK")
</pallas_src>

<mosaic_0001>
module attributes {stable_mosaic.version = 11 : i64} {
  func.func @copy_kernel(%arg0: i32, %arg1: memref<1x1024xf32, #tpu.memory_space<vmem>>, %arg2: memref<1x1024xf32, #tpu.memory_space<vmem>>) attributes {dimension_semantics = [#tpu.dimension_semantics<parallel>], iteration_bounds = array<i64: 1>, scalar_prefetch = 0 : i64, scratch_operands = 0 : i64, tpu.core_type = #tpu.core_type<tc>, window_params = [{transform_indices = @transform_0, window_bounds = array<i64: 1, 1024>}, {transform_indices = @transform_1, window_bounds = array<i64: 1, 1024>}]} {
    %c0 = arith.constant 0 : index
    %c0_0 = arith.constant 0 : index
    %0 = vector.load %arg1[%c0, %c0_0] : memref<1x1024xf32, #tpu.memory_space<vmem>>, vector<1x1024xf32>
    %c0_1 = arith.constant 0 : index
    %c0_2 = arith.constant 0 : index
    %1 = vector.load %arg2[%c0_1, %c0_2] : memref<1x1024xf32, #tpu.memory_space<vmem>>, vector<1x1024xf32>
    tpu.vector_store %arg2[%c0_1, %c0_2], %0 {strides = array<i32>} : memref<1x1024xf32, #tpu.memory_space<vmem>>, vector<1x1024xf32>,
    return
  }
  func.func @transform_0(%arg0: i32) -> (i32, i32) {
    %c0_i32 = arith.constant 0 : i32
    %c0_i32_0 = arith.constant 0 : i32
    return %arg0, %c0_i32 : i32, i32
  }
  func.func @transform_1(%arg0: i32) -> (i32, i32) {
    %c0_i32 = arith.constant 0 : i32
    %c0_i32_0 = arith.constant 0 : i32
    return %arg0, %c0_i32 : i32, i32
  }
}

</mosaic_0001>

<bundles_post_ra>
// kernel: tpu_custom_call.1
= control target key start
LH: loop header
LB: loop body
LE: loop exit
PB: predicated region body
PF: predicated region fallthrough
CT: control target
= control target key end

     0   :  { %6 = vsyncpa [#allocation3], 0  ;;  %s124_s0 = inlined_call_operand.hbm [shape: f32[1,1024], index: 0, kind: input, shape index: {}, may-alias: {0,1}]   ;;  %s125_s1 = inlined_call_operand.hbm [shape: f32[1,1024], index: 1, kind: output, shape index: {}, may-alias: {0,1}]  }
   0x1   :  { %7 = vsyncpa [#allocation4], 0  ;;  %s88_s6 = smov [#allocation2]   ;;  %s40_s10 = scalar_lea.hbm %s124_s0, 128 }
   0x2   :  { %s14_s7 = sshll.u32 %s88_s6, 4  ;;  %p41_p0 = scmp.ne.s32.totalorder %s124_s0, %s40_s10  ;;  %s15_s7 = int_to_ptr.vmem [resolvable:$true] %s14_s7 }
   0x3   :  { %p44_p1 = scmp.lt.u32.totalorder %s40_s10, %s124_s0 }
   0x5   :  { %p46_p2 = pnand %p44_p1, %p41_p0 }
   0x7   :  { %49 = shalt.err (!%p46_p2)
}
   0x8   :  { %s50_s15 = scalar_lea.vmem %s15_s7, 128  ;;  %p55_p4 = scmp.lt.s32.totalorder %s15_s7, %s15_s7 }
   0x9   :  { %p51_p3 = scmp.ne.s32.totalorder %s15_s7, %s50_s15  ;;  %p56_p5 = scmp.lt.s32.totalorder %s50_s15, %s50_s15 }
   0xb   :  { %p57_p6 = por %p56_p5, %p55_p4 }
   0xd   :  { %p58_p7 = pnand %p57_p6, %p51_p3 }
   0xf   :  { %61 = shalt.err (!%p58_p7)
}
  0x10   :  { %17 = dma.hbm_to_vmem [thread:$0]  %s124_s0, 128, %s15_s7, [#allocation3]  }
  0x11   :  { %84 = dma.done.wait [#allocation3], 128  }
  0x12   :  { %85 = vsyncadd [#allocation3], 4294967168  ;;  %s89_s18 = smov [#allocation5]   ;;  %v21_v0 = vld [vmem:[#allocation2] sm:$0xff] }
  0x13   :  { %s29_s19 = sshll.u32 %s89_s18, 4  ;;  %22 = vst [vmem:[#allocation5] sm:$0xff] %v21_v0  ;;  %s30_s19 = int_to_ptr.vmem [resolvable:$true] %s29_s19 }
  0x14   :  { %s62_s20 = scalar_lea.vmem %s30_s19, 128  ;;  %p67_p9 = scmp.lt.s32.totalorder %s30_s19, %s30_s19 }
  0x15   :  { %p63_p8 = scmp.ne.s32.totalorder %s30_s19, %s62_s20  ;;  %p68_p10 = scmp.lt.s32.totalorder %s62_s20, %s62_s20 }
  0x17   :  { %p69_p11 = por %p68_p10, %p67_p9 }
  0x19   :  { %p70_p12 = pnand %p69_p11, %p63_p8 }
  0x1b   :  { %73 = shalt.err (!%p70_p12)
}
  0x1c   :  { %s74_s23 = scalar_lea.hbm %s125_s1, 128 }
  0x1d   :  { %p75_p13 = scmp.ne.s32.totalorder %s125_s1, %s74_s23  ;;  %p78_p0 = scmp.lt.u32.totalorder %s74_s23, %s125_s1 }
  0x1f   :  { %p80_p1 = pnand %p78_p0, %p75_p13 }
  0x21   :  { %83 = shalt.err (!%p80_p1)
}
  0x22   :  { %32 = dma.vmem_to_hbm [thread:$0]  %s30_s19, 128, %s125_s1, [#allocation4]  }
  0x23   :  { %86 = dma.done.wait [#allocation4], 128  }
  0x24   :  { %87 = vsyncadd [#allocation4], 4294967168 }
  0x25   :  { %36 = vsyncpa [#allocation3], 1 }
  0x26   :  { %37 = vsyncpa [#allocation4], 1 }

</bundles_post_ra>
